<compile_context>
chip_gen: v7x
topology: tpu7x:2x2x1
jax: 0.10.0
libtpu: 0.0.40
codegen_flags: <defaults>
</compile_context>

<pallas_src>
import jax
import jax.numpy as jnp
from jax import lax
from jax.experimental import pallas as pl
from jax.experimental.pallas import tpu as pltpu

LEAKY_SLOPE = 0.1
BN_EPS = 1e-5


def _pick_tile_l(L, cap=1024):
    """Largest multiple-of-128 divisor of L that is <= cap, else full L."""
    best = None
    t = 128
    while t <= min(L, cap):
        if L % t == 0:
            best = t
        t += 128
    return best if best is not None else L


def _pick_tile_n(N):
    """Largest divisor of N that still leaves >=2 batch tiles (v7x megacore)."""
    cap = min(max(1, N // 2), 8)
    best = 1
    for t in range(1, cap + 1):
        if N % t == 0:
            best = t
    return best


def _vmem_budget():
    cap = 128 * 1024 * 1024
    try:
        cap = int(pltpu.get_tpu_info().vmem_capacity_bytes)
    except Exception:
        pass
    return max(16 * 1024 * 1024, min(int(cap * 0.6), 40 * 1024 * 1024))


# ----------------------------------------------------------------------------
# Shared in-kernel helper: conv (K taps fused into one matmul) + bias + leaky.
# ----------------------------------------------------------------------------
def _conv_row(xr, w, b):
    # xr: (Cin, tile_l + K - 1) bf16 halo'd input row
    # w : (Cout, K*Cin)         bf16
    # b : (Cout, 1)             f32
    cin = xr.shape[0]
    k = w.shape[1] // cin
    tl = xr.shape[1] - (k - 1)
    # Build the (K*Cin, tile_l) tap slab in VMEM (lane shifts are XLU work).
    slab = jnp.concatenate([xr[:, t:t + tl] for t in range(k)], axis=0)
    acc = jnp.dot(w, slab, preferred_element_type=jnp.float32)   # (Cout, tl) f32
    y = acc + b                                                  # bias broadcast over lanes
    return jnp.where(y > 0, y, LEAKY_SLOPE * y)                  # LeakyReLU(0.1)


# ----------------------------------------------------------------------------
# Pass 1: stats only — per-channel sum / sum-of-squares of the activation,
# accumulated over the L-tile axis into a resident per-batch-tile block.
# ----------------------------------------------------------------------------
def _conv_stats_kernel(xcol_ref, w_ref, b_ref, stats_ref):
    j = pl.program_id(1)                 # L-tile index ("arbitrary" accumulation axis)
    w = w_ref[...]
    b = b_ref[...]
    part = None
    for r in range(xcol_ref.shape[0]):   # static unrolled loop over batch rows in tile
        y = _conv_row(xcol_ref[r, 0], w, b)                 # (Cout, tl) f32
        s = jnp.sum(y, axis=1, keepdims=True)               # (Cout, 1)
        ss = jnp.sum(y * y, axis=1, keepdims=True)          # (Cout, 1)
        row = jnp.concatenate([s, ss], axis=1)              # (Cout, 2)
        part = row if part is None else part + row

    @pl.when(j == 0)
    def _init():
        stats_ref[0] = part

    @pl.when(j != 0)
    def _accumulate():
        stats_ref[0] += part


# ----------------------------------------------------------------------------
# Pass 2: recompute conv+bias+LeakyReLU, apply BN scale/shift, store final NCL
# output directly (optionally with the dense concat fused in).
# ----------------------------------------------------------------------------
def _conv_bn_kernel(xcol_ref, w_ref, b_ref, scale_ref, shift_ref, o_ref):
    w = w_ref[...]
    b = b_ref[...]
    sc = scale_ref[...]
    sh = shift_ref[...]
    for r in range(xcol_ref.shape[0]):
        y = _conv_row(xcol_ref[r, 0], w, b)
        o_ref[r] = (y * sc + sh).astype(o_ref.dtype)


def _conv_bn_dense_kernel(xcol_ref, w_ref, b_ref, scale_ref, shift_ref,
                          x_ref, o_ref):
    w = w_ref[...]
    b = b_ref[...]
    sc = scale_ref[...]
    sh = shift_ref[...]
    cin = x_ref.shape[1]
    cout = w.shape[0]
    for r in range(xcol_ref.shape[0]):
        y = _conv_row(xcol_ref[r, 0], w, b)
        o_ref[r, 0:cin, :] = x_ref[r].astype(o_ref.dtype)
        o_ref[r, cin:cin + cout, :] = (y * sc + sh).astype(o_ref.dtype)


def conv_layer_forward(x_ncl, weight, bias, gamma, beta, *, dense=False,
                       tile_n=None, tile_l=None):
    """x_ncl: (N, Cin, L) PyTorch Conv1d layout; weight: (Cout, Cin, K)."""
    N, Cin, L = x_ncl.shape
    Cout, cin_w, K = weight.shape
    assert cin_w == Cin and K % 2 == 1
    pad = (K - 1) // 2
    c_total = (Cin + Cout) if dense else Cout

    vmem_limit = _vmem_budget()

    if tile_n is None:
        tile_n = _pick_tile_n(N)
    auto_l = tile_l is None
    if auto_l:
        tile_l = _pick_tile_l(L)
    assert N % tile_n == 0 and L % tile_l == 0
    assert tile_l % 128 == 0 or tile_l == L, "tile_l must be a multiple of 128 or L"

    def _est(tl):
        window = tl + K - 1
        xblk = tile_n * Cin * window * 2
        wblk = Cout * K * Cin * 2
        oblk = tile_n * c_total * tl * 4
        xf32 = tile_n * Cin * tl * 4 if dense else 0
        temps = 6 * tile_n * Cout * tl * 4 + 2 * tile_n * K * Cin * tl * 2
        return 2 * (xblk + wblk + oblk + xf32) + temps

    if auto_l:
        while (_est(tile_l) > int(0.8 * vmem_limit) and tile_l % 256 == 0
               and L % (tile_l // 2) == 0):
            tile_l //= 2

    n_tiles_n = N // tile_n
    n_tiles_l = L // tile_l
    window = tile_l + K - 1

    # ---- wrapper glue (fused with the required f32->bf16 cast): halo'd L tiles ----
    xpad = jnp.pad(x_ncl, ((0, 0), (0, 0), (pad, pad)))                 # (N, Cin, L+K-1)
    xtiles = jnp.stack(
        [xpad[:, :, j * tile_l: j * tile_l + window] for j in range(n_tiles_l)],
        axis=1).astype(jnp.bfloat16)                                    # (N, ntl, Cin, window)

    w = jnp.transpose(weight, (0, 2, 1)).reshape(Cout, K * Cin).astype(jnp.bfloat16)
    b = bias.astype(jnp.float32).reshape(Cout, 1)

    conv_flops = 2 * N * L * K * Cin * Cout

    # ---- pass 1: stats only (no activation written to HBM) ----
    stats = pl.pallas_call(
        _conv_stats_kernel,
        out_shape=jax.ShapeDtypeStruct((n_tiles_n, Cout, 2), jnp.float32),
        grid=(n_tiles_n, n_tiles_l),
        in_specs=[
            pl.BlockSpec((tile_n, 1, Cin, window), lambda i, j: (i, j, 0, 0)),
            pl.BlockSpec((Cout, K * Cin), lambda i, j: (0, 0)),
            pl.BlockSpec((Cout, 1), lambda i, j: (0, 0)),
        ],
        out_specs=pl.BlockSpec((1, Cout, 2), lambda i, j: (i, 0, 0)),
        compiler_params=pltpu.CompilerParams(
            dimension_semantics=("parallel", "arbitrary"),
            vmem_limit_bytes=vmem_limit),
        cost_estimate=pl.CostEstimate(
            flops=conv_flops, transcendentals=0,
            bytes_accessed=xtiles.size * 2 + w.size * 2 + b.size * 4
                           + n_tiles_n * Cout * 2 * 4),
    )(xtiles, w, b)

    # ---- tiny glue: global per-channel mean / var -> BN scale & shift ----
    total = jnp.sum(stats, axis=0)                         # (Cout, 2)
    count = float(N * L)
    mean = total[:, 0] / count
    var = jnp.maximum(total[:, 1] / count - mean * mean, 0.0)
    inv = lax.rsqrt(var + BN_EPS)
    g = gamma.astype(jnp.float32)
    be = beta.astype(jnp.float32)
    scale = (g * inv).reshape(Cout, 1)
    shift = (be - mean * g * inv).reshape(Cout, 1)

    # ---- pass 2: recompute conv+act, apply BN, write final NCL output ----
    in_specs = [
        pl.BlockSpec((tile_n, 1, Cin, window), lambda i, j: (i, j, 0, 0)),
        pl.BlockSpec((Cout, K * Cin), lambda i, j: (0, 0)),
        pl.BlockSpec((Cout, 1), lambda i, j: (0, 0)),
        pl.BlockSpec((Cout, 1), lambda i, j: (0, 0)),
        pl.BlockSpec((Cout, 1), lambda i, j: (0, 0)),
    ]
    args = [xtiles, w, b, scale, shift]
    kernel = _conv_bn_kernel
    bytes2 = (xtiles.size * 2 + w.size * 2 + 3 * Cout * 4
              + N * c_total * L * 4)
    if dense:
        in_specs.append(pl.BlockSpec((tile_n, Cin, tile_l), lambda i, j: (i, 0, j)))
        args.append(x_ncl.astype(jnp.float32))
        kernel = _conv_bn_dense_kernel
        bytes2 += N * Cin * L * 4

    out = pl.pallas_call(
        kernel,
        out_shape=jax.ShapeDtypeStruct((N, c_total, L), jnp.float32),
        grid=(n_tiles_n, n_tiles_l),
        in_specs=in_specs,
        out_specs=pl.BlockSpec((tile_n, c_total, tile_l), lambda i, j: (i, 0, j)),
        compiler_params=pltpu.CompilerParams(
            dimension_semantics=("parallel", "parallel"),
            vmem_limit_bytes=vmem_limit),
        cost_estimate=pl.CostEstimate(
            flops=conv_flops + 4 * N * L * Cout, transcendentals=0,
            bytes_accessed=bytes2),
    )(*args)
    return out


def _reference_forward(x_ncl, weight, bias, gamma, beta, *, dense=False):
    """Pure-JAX reference mirroring the PyTorch forward (train-mode BN).

    Conv operands are cast to bf16 to match the kernel's MXU numerics; all
    accumulation and elementwise math stays in f32.
    """
    pad = (weight.shape[-1] - 1) // 2
    y = lax.conv_general_dilated(
        x_ncl.astype(jnp.bfloat16), weight.astype(jnp.bfloat16),
        window_strides=(1,), padding=[(pad, pad)],
        dimension_numbers=("NCH", "OIH", "NCH"),
        preferred_element_type=jnp.float32)
    y = y + bias[None, :, None]
    y = jnp.where(y > 0, y, LEAKY_SLOPE * y)
    mean = jnp.mean(y, axis=(0, 2), keepdims=True)
    var = jnp.mean((y - mean) ** 2, axis=(0, 2), keepdims=True)
    y = (y - mean) * lax.rsqrt(var + BN_EPS) * gamma[None, :, None] + beta[None, :, None]
    return jnp.concatenate([x_ncl, y], axis=1) if dense else y


if __name__ == "__main__":
    key = jax.random.PRNGKey(0)
    k_x, k_w, k_b, k_g, k_be = jax.random.split(key, 5)

    N, Cin, Cout, L, K = 2, 4, 8, 256, 3

    x = jax.random.normal(k_x, (N, Cin, L), jnp.float32)
    weight = jax.random.normal(k_w, (Cout, Cin, K), jnp.float32) * 0.2
    bias = jax.random.normal(k_b, (Cout,), jnp.float32) * 0.1
    gamma = 1.0 + 0.1 * jax.random.normal(k_g, (Cout,), jnp.float32)
    beta = 0.1 * jax.random.normal(k_be, (Cout,), jnp.float32)

    # tile_n=1, tile_l=128 forces a (2, 2) grid so the multi-L-tile stats
    # accumulator and the parallel batch axis are both exercised.
    out = conv_layer_forward(x, weight, bias, gamma, beta, dense=False,
                             tile_n=1, tile_l=128)
    out = jax.block_until_ready(out)

    ref = _reference_forward(x, weight, bias, gamma, beta, dense=False)
    assert out.shape == (N, Cout, L)
    assert jnp.allclose(out, ref, rtol=2e-3, atol=2e-3), "mismatch vs reference"

    # dense=True branch (concat fused into pass 2), auto-picked tiles.
    out_dense = jax.block_until_ready(
        conv_layer_forward(x, weight, bias, gamma, beta, dense=True))
    ref_dense = _reference_forward(x, weight, bias, gamma, beta, dense=True)
    assert out_dense.shape == (N, Cin + Cout, L)
    assert jnp.allclose(out_dense[:, :Cin], x, rtol=1e-6, atol=1e-6)
    assert jnp.allclose(out_dense[:, Cin:], ref_dense[:, Cin:], rtol=2e-3, atol=2e-3)

    print("KERNEL_OK")
</pallas_src>

<mosaic_0001>
module attributes {stable_mosaic.version = 11 : i64} {
  func.func @_conv_stats_kernel(%arg0: i32, %arg1: i32, %arg2: memref<1x1x4x130xbf16, #tpu.memory_space<vmem>>, %arg3: memref<8x12xbf16, #tpu.memory_space<vmem>>, %arg4: memref<8x1xf32, #tpu.memory_space<vmem>>, %arg5: memref<1x8x2xf32, #tpu.memory_space<vmem>>) attributes {dimension_semantics = [#tpu.dimension_semantics<parallel>, #tpu.dimension_semantics<arbitrary>], iteration_bounds = array<i64: 2, 2>, scalar_prefetch = 0 : i64, scratch_operands = 0 : i64, tpu.core_type = #tpu.core_type<tc>, window_params = [{transform_indices = @transform_0, window_bounds = array<i64: 1, 1, 4, 130>}, {pipeline_mode = #tpu.pipeline_mode<synchronous>, transform_indices = @transform_1, window_bounds = array<i64: 8, 12>}, {pipeline_mode = #tpu.pipeline_mode<synchronous>, transform_indices = @transform_2, window_bounds = array<i64: 8, 1>}, {transform_indices = @transform_3, window_bounds = array<i64: 1, 8, 2>}]} {
    %c0 = arith.constant 0 : index
    %c0_0 = arith.constant 0 : index
    %0 = vector.load %arg3[%c0, %c0_0] : memref<8x12xbf16, #tpu.memory_space<vmem>>, vector<8x12xbf16>
    %c0_1 = arith.constant 0 : index
    %c0_2 = arith.constant 0 : index
    %1 = vector.load %arg4[%c0_1, %c0_2] : memref<8x1xf32, #tpu.memory_space<vmem>>, vector<8x1xf32>
    %c0_3 = arith.constant 0 : index
    %c0_4 = arith.constant 0 : index
    %c0_5 = arith.constant 0 : index
    %c0_6 = arith.constant 0 : index
    %2 = vector.load %arg2[%c0_3, %c0_4, %c0_5, %c0_6] : memref<1x1x4x130xbf16, #tpu.memory_space<vmem>>, vector<1x1x4x130xbf16>
    %3 = vector.shape_cast %2 : vector<1x1x4x130xbf16> to vector<4x130xbf16>
    %4 = vector.extract_strided_slice %3 {offsets = [0, 0], sizes = [4, 128], strides = [1, 1]} : vector<4x130xbf16> to vector<4x128xbf16>
    %5 = vector.extract_strided_slice %3 {offsets = [0, 1], sizes = [4, 128], strides = [1, 1]} : vector<4x130xbf16> to vector<4x128xbf16>
    %6 = vector.extract_strided_slice %3 {offsets = [0, 2], sizes = [4, 128], strides = [1, 1]} : vector<4x130xbf16> to vector<4x128xbf16>
    %7 = tpu.concatenate %4, %5, %6 in 0 : vector<4x128xbf16>, vector<4x128xbf16>, vector<4x128xbf16> -> vector<12x128xbf16>
    %cst = arith.constant dense<0.000000e+00> : vector<8x128xf32>
    %8 = tpu.matmul %0, %7, %cst {dimension_numbers = #tpu.dot_dimension_numbers<[1], [0], [0], [1], [0, 0, 1, 1], [], []>} : vector<8x12xbf16>, vector<12x128xbf16>, vector<8x128xf32> -> vector<8x128xf32>
    %9 = vector.broadcast %1 : vector<8x1xf32> to vector<8x128xf32>
    %10 = arith.addf %8, %9 : vector<8x128xf32>
    %cst_7 = arith.constant 0.000000e+00 : f32
    %11 = vector.broadcast %cst_7 : f32 to vector<8x128xf32>
    %12 = arith.cmpf ogt, %10, %11 : vector<8x128xf32>
    %cst_8 = arith.constant 1.000000e-01 : f32
    %13 = vector.broadcast %cst_8 : f32 to vector<8x128xf32>
    %14 = arith.mulf %13, %10 : vector<8x128xf32>
    %15 = arith.select %12, %10, %14 : vector<8x128xi1>, vector<8x128xf32>
    %cst_9 = arith.constant dense<0.000000e+00> : vector<8xf32>
    %16 = vector.multi_reduction <add>, %15, %cst_9 [1] : vector<8x128xf32> to vector<8xf32>
    %17 = vector.shape_cast %16 : vector<8xf32> to vector<8x1xf32>
    %18 = arith.mulf %15, %15 : vector<8x128xf32>
    %cst_10 = arith.constant dense<0.000000e+00> : vector<8xf32>
    %19 = vector.multi_reduction <add>, %18, %cst_10 [1] : vector<8x128xf32> to vector<8xf32>
    %20 = vector.shape_cast %19 : vector<8xf32> to vector<8x1xf32>
    %21 = tpu.concatenate %17, %20 in 1 : vector<8x1xf32>, vector<8x1xf32> -> vector<8x2xf32>
    %c0_i32 = arith.constant 0 : i32
    %22 = arith.cmpi eq, %arg1, %c0_i32 : i32
    %23 = arith.extui %22 : i1 to i32
    %c0_i32_11 = arith.constant 0 : i32
    %24 = arith.cmpi ne, %23, %c0_i32_11 : i32
    scf.if %24 {
      %c0_14 = arith.constant 0 : index
      %c0_15 = arith.constant 0 : index
      %c0_16 = arith.constant 0 : index
      %28 = vector.load %arg5[%c0_14, %c0_15, %c0_16] : memref<1x8x2xf32, #tpu.memory_space<vmem>>, vector<1x8x2xf32>
      %29 = vector.shape_cast %28 : vector<1x8x2xf32> to vector<8x2xf32>
      %30 = vector.shape_cast %21 : vector<8x2xf32> to vector<1x8x2xf32>
      tpu.vector_store %arg5[%c0_14, %c0_15, %c0_16], %30 {strides = array<i32>} : memref<1x8x2xf32, #tpu.memory_space<vmem>>, vector<1x8x2xf32>,
    } else {
    }
    %c0_i32_12 = arith.constant 0 : i32
    %25 = arith.cmpi ne, %arg1, %c0_i32_12 : i32
    %26 = arith.extui %25 : i1 to i32
    %c0_i32_13 = arith.constant 0 : i32
    %27 = arith.cmpi ne, %26, %c0_i32_13 : i32
    scf.if %27 {
      %c0_14 = arith.constant 0 : index
      %c0_15 = arith.constant 0 : index
      %c0_16 = arith.constant 0 : index
      %28 = vector.load %arg5[%c0_14, %c0_15, %c0_16] : memref<1x8x2xf32, #tpu.memory_space<vmem>>, vector<1x8x2xf32>
      %29 = vector.shape_cast %28 : vector<1x8x2xf32> to vector<8x2xf32>
      %30 = arith.addf %29, %21 : vector<8x2xf32>
      %c0_17 = arith.constant 0 : index
      %c0_18 = arith.constant 0 : index
      %c0_19 = arith.constant 0 : index
      %31 = vector.load %arg5[%c0_17, %c0_18, %c0_19] : memref<1x8x2xf32, #tpu.memory_space<vmem>>, vector<1x8x2xf32>
      %32 = vector.shape_cast %31 : vector<1x8x2xf32> to vector<8x2xf32>
      %33 = vector.shape_cast %30 : vector<8x2xf32> to vector<1x8x2xf32>
      tpu.vector_store %arg5[%c0_17, %c0_18, %c0_19], %33 {strides = array<i32>} : memref<1x8x2xf32, #tpu.memory_space<vmem>>, vector<1x8x2xf32>,
    } else {
    }
    return
  }
  func.func @transform_0(%arg0: i32, %arg1: i32) -> (i32, i32, i32, i32) {
    %c0_i32 = arith.constant 0 : i32
    %c0_i32_0 = arith.constant 0 : i32
    %c0_i32_1 = arith.constant 0 : i32
    return %arg0, %arg1, %c0_i32, %c0_i32_0 : i32, i32, i32, i32
  }
  func.func @transform_1(%arg0: i32, %arg1: i32) -> (i32, i32) {
    %c0_i32 = arith.constant 0 : i32
    %c0_i32_0 = arith.constant 0 : i32
    %c0_i32_1 = arith.constant 0 : i32
    return %c0_i32, %c0_i32_0 : i32, i32
  }
  func.func @transform_2(%arg0: i32, %arg1: i32) -> (i32, i32) {
    %c0_i32 = arith.constant 0 : i32
    %c0_i32_0 = arith.constant 0 : i32
    %c0_i32_1 = arith.constant 0 : i32
    return %c0_i32, %c0_i32_0 : i32, i32
  }
  func.func @transform_3(%arg0: i32, %arg1: i32) -> (i32, i32, i32) {
    %c0_i32 = arith.constant 0 : i32
    %c0_i32_0 = arith.constant 0 : i32
    %c0_i32_1 = arith.constant 0 : i32
    return %arg0, %c0_i32, %c0_i32_0 : i32, i32, i32
  }
}

</mosaic_0001>

<bundles_post_ra>
// kernel: tpu_custom_call.1
= control target key start
LH: loop header
LB: loop body
LE: loop exit
PB: predicated region body
PF: predicated region fallthrough
CT: control target
= control target key end

     0   :  { %8 = vsyncpa [#allocation3], 0  ;;  %s790_s0 = inlined_call_operand.hbm [shape: bf16[2,2,4,130], index: 0, kind: input, shape index: {}]   ;;  %s791_s1 = inlined_call_operand.vmem [shape: bf16[8,12], index: 1, kind: input, shape index: {}]   ;;  %s792_s2 = inlined_call_operand.vmem [shape: f32[8,1], index: 2, kind: input, shape index: {}]   ;;  %s793_s3 = inlined_call_operand.vmem [shape: f32[2,8,2], index: 3, kind: output, shape index: {}]  }
   0x1   :  { %10 = vsyncpa [#allocation3 + $0x1], 0  ;;  %s627_s12 = smov 0   ;;  %s629_s13 = smov 0  }
   0x2   :  { %s631_s14 = smov 0   ;;  %s633_s15 = smov 0  }
   0x3   :  { %s635_s16 = smov 0   ;;  %s637_s17 = smov 0  }
   0x4   :  { %s639_s18 = smov 0   ;;  %s641_s19 = smov 0  }
   0x5 LB: > { %s399_s20 = sadd.s32 4294967295, %s598_s19   ;;  %s25_s21 = sadd.s32 1, %s590_s17  ;;  %s598_s19 = sphi %s641_s19, %s16_s19   ;;  %s594_s18 = sphi %s639_s18, %s805_s18   ;;  %s590_s17 = sphi %s637_s17, %s804_s17   ;;  %s586_s16 = sphi %s635_s16, %s803_s16   ;;  %s582_s15 = sphi %s633_s15, %s802_s15   ;;  %s578_s14 = sphi %s631_s14, %s801_s14   ;;  %s574_s13 = sphi %s629_s13, %s800_s13   ;;  %s570_s12 = sphi %s627_s12, %s799_s12  }
   0x6   : > { %p26_p0 = scmp.ge.s32.totalorder %s25_s21, 2  ;;  %s28_s22 = sadd.s32 1, %s594_s18 }
   0x7   : > { %s37_s23 = sadd.s32 1, %s578_s14  ;;  %p44_p1 = scmp.ne.s32.totalorder %s578_s14, %s574_s13 }
   0x8   : > { %s807_s21 = smov (%p26_p0, %s25_s21), 0  ;;  %s809_s22 = smov (!%p26_p0, %s28_s22), %s594_s18 }
   0x9   : > { %s33_s24 = ssub.s32 %s590_s17, %s807_s21  ;;  %p45_p2 = scmp.eq.s32.totalorder %s598_s19, 0 }
   0xa   : > { %p30_p3 = scmp.ge.s32.totalorder %s809_s22, 2  ;;  %p50_p4 = scmp.ne.s32.totalorder %s574_s13, %s570_s12 }
   0xb   : > { %p678_p5 = por %p45_p2, %p44_p1  ;;  %p51_p6 = scmp.eq.s32.totalorder %s399_s20, 0 }
   0xc   : > { %s811_s22 = smov (%p30_p3, %s809_s22), 0  ;;  %p429_p8 = scmp.lt.s32.totalorder %s598_s19, 4 }
   0xd   : > { %p684_p7 = por %p51_p6, %p50_p4  ;;  %s32_s27 = ssub.s32 %s594_s18, %s811_s22 }
   0xe   : > { %s34_s28 = sor.u32 %s33_s24, %s32_s27  ;;  %s148_s29 = sand.u32 1, %s578_s14  }
   0xf   : > { %p35_p9 = scmp.eq.s32.totalorder %s34_s28, 0  ;;  %s403_s30 = sshll.u32 %s148_s29, 2 }
  0x10   : > { %s404_s4 = sshll.u32 %s590_s17, 1  ;;  %s405_s6 = sshll.u32 %s594_s18, 2 }
  0x11   : > { %s694_s5 = scalar_select %p35_p9, %s578_s14, %s37_s23  }
  0x12   : > { %s158_s7 = sadd.s32 %s405_s6, %s404_s4  ;;  %s152_s8 = scalar_lea.vmem [#allocation2], %s403_s30 }
  0x13   : > { %s162_s9 = sshll.u32 %s152_s8, 4  ;;  %s406_s10 = sshll.u32 %s158_s7, 5  ;;  %s697_s9 = int_to_ptr.vmem [resolvable:$true] %s162_s9 }
  0x14   : > { %s702_s20 = scalar_lea.hbm %s790_s0, %s406_s10  ;;  %p708_p10 = pnand %p429_p8, %p678_p5 }
  0x15   : > { %s149_s24 = scalar_lea.sflag [#allocation3], %s148_s29  ;;  %s502_s27 = scalar_lea.hbm %s702_s20, 64 }
  0x16   : > { %p503_p13 = scmp.ne.s32.totalorder %s702_s20, %s502_s27  ;;  %p504_p0 = pneg %p708_p10 }
  0x17   : > { %s507_s30 = scalar_lea.hbm %s790_s0, 256  ;;  %p508_p3 = scmp.lt.u32.totalorder %s702_s20, %s790_s0 }
  0x18   : > { %p505_p1 = pnand %p504_p0, %p503_p13  ;;  %p509_p4 = scmp.lt.u32.totalorder %s507_s30, %s502_s27 }
  0x19   : > { %p511_p6 = scmp.lt.u32.totalorder %s502_s27, %s702_s20 }
  0x1a   : > { %p506_p2 = pneg %p505_p1  ;;  %p510_p5 = por %p509_p4, %p508_p3 }
  0x1c   : > { %p512_p8 = por %p511_p6, %p510_p5 }
  0x1e   : > { %p513_p9 = pnand %p512_p8, %p506_p2 }
  0x20   : > { %516 = shalt.err (!%p513_p9)
}
  0x21   : > { %s517_s29 = scalar_lea.vmem %s697_s9, 64  ;;  %s600_s7 = smov [#allocation2]  }
  0x22   : > { %p518_p13 = scmp.ne.s32.totalorder %s697_s9, %s517_s29  ;;  %s522_s8 = sshll.u32 %s600_s7, 4  ;;  %s523_s8 = int_to_ptr.vmem [resolvable:$false] %s522_s8 }
  0x23   : > { %s524_s10 = scalar_lea.vmem %s523_s8, 128  ;;  %p525_p12 = scmp.lt.s32.totalorder %s697_s9, %s523_s8 }
  0x24   : > { %p520_p1 = pnand %p518_p13, %p504_p0  ;;  %p526_p3 = scmp.lt.s32.totalorder %s524_s10, %s517_s29 }
  0x26   : > { %p521_p11 = pneg %p520_p1  ;;  %p527_p4 = por %p526_p3, %p525_p12 }
  0x28   : > { %p528_p5 = pnand %p527_p4, %p521_p11 }
  0x2a   : > { %531 = shalt.err (!%p528_p5)
}
  0x2b   : > { %428 = dma.hbm_to_vmem [thread:$0]  (!%p708_p10), %s702_s20, 64, %s697_s9, %s149_s24  }
  0x2c   : > { %p797_p2 = scmp.lt.s32.totalorder %s598_s19, 5  ;;  %p798_p6 = scmp.ge.s32.totalorder %s598_s19, 1 }
  0x2e   : > { %p168_p0 = pnand %p798_p6, %p797_p2 }
  0x2f   : > { %s173_s11 = sand.u32 (!%p168_p0), 1, %s574_s13  }
  0x30   : > { %171 = sbr.rel (%p168_p0) target bundleno = 565 (0x235), region = 32  ;;  %s408_s12 = sshll.u32 (!%p168_p0), %s173_s11, 2 }
  0x31   : > { %s174_s27 = scalar_lea.sflag (!%p168_p0), [#allocation3], %s173_s11  ;;  %s177_s25 = scalar_lea.vmem (!%p168_p0), [#allocation2], %s408_s12 }
  0x37   : > { %565 = dma.done.wait (%p684_p7), %s174_s27, 64  }
  0x38   : > { %567 = vsyncadd (%p684_p7), %s174_s27, 4294967232  ;;  %v212_v0 = vlaneseq  ;;  %v601_v1 = vmov 1983009808   ;;  %p199_p10 = scmp.lt.s32.totalorder %s586_s16, 1  ;;  %v602_v5 = vmov 0.0   ;;  %vm603_vm0 = vmmov 0  }
  0x39   : > { %v210_v2 = vunpack.c.l.s4 %v601_v1  ;;  %417 = vmatprep.subr.bf16.mxu0 %v602_v5  ;;  %v206_v7 = vld [vmem:[%s177_s25] sm:$0xf]  ;;  %419 = vmatprep.mubr.msk.bf16.mxu0 %vm603_vm0, %v602_v5  ;;  %v604_v12 = vmov 0   ;;  %s605_s24 = smov 126   ;;  %s606_s28 = smov 127   ;;  %vm235_vm1 = vcmask 1031168  }
  0x3a   : > { %v213_v3 = vshrl.u32 %v212_v0, 7  ;;  %s813_s16 = smov (!%p199_p10, %s586_s16), 1  ;;  %v208_v9 = vcombine.low %v206_v7, %v206_v7  ;;  %500 = vset.pattern.permute.xlu0 %v604_v12  ;;  %v205_v14 = vld [vmem:[%s792_s2] sm:$0xff]  ;;  %vm228_vm2 = vcmask 1039360   ;;  %vm237_vm3 = vcmask 1041408   ;;  %p411_p7 = scmp.ne.s32.totalorder %s582_s15, 0 }
  0x3b   : > { %v211_v4 = vunpack.c.0.s8 %v210_v2  ;;  %s409_s9 = sshll.u32 %s813_s16, 3  ;;  %vm241_vm4 = vcmask 1043456   ;;  %vm253_vm5 = vcmask 1045504   ;;  %v204_v24 = vld [vmem:[%s791_s1] sm:$0xf]  ;;  %vm249_vm6 = vcmask 97280  }
  0x3c   : > { %s753_s26 = scalar_lea.vmem %s793_s3, %s409_s9  ;;  %vm304_vm8 = vcmask 7168   ;;  %vm310_vm9 = vcmask (!%p411_p7), 15360  }
  0x3d   : > { %v214_v6 = vsub.s32 %v211_v4, %v213_v3 }
  0x3f   : > { %v222_v8 = vrot.slane %v206_v7, %v214_v6  ;;  %v215_v11 = vrot.slane %v208_v9, %v214_v6 }
  0x41   : > { %v230_v10 = vcombine.low %v222_v8, %v222_v8  ;;  %224 = vrot.lane.b32.xlu0 %v215_v11, %s606_s28  ;;  %v223_v13 = vcombine.high %v215_v11, %v215_v11 }
  0x43   : > { %231 = vrot.lane.b32.xlu1 %v230_v10, %s605_s24 }
  0x45   : > { %226 = vrot.lane.b32.xlu0 %v223_v13, %s606_s28 }
  0x47   : > { %233 = vrot.lane.b32.xlu1 %v222_v8, %s605_s24 }
  0x49   : > { %246 = vperm.xlu0 %500, %v205_v14  }
  0xb3   : > { %v225_v16 = vpop.permute.xlu0 %224 }
  0xb5   : > { %v232_v15 = vpop.permute.xlu1 %231 }
  0xb7   : > { %v227_v18 = vpop.permute.xlu0 %226 }
  0xb8   : > { %v229_v20 = vsel %vm228_vm2, %v225_v16, %v227_v18 }
  0xb9   : > { %v234_v17 = vpop.permute.xlu1 %233  ;;  %v240_v21 = vsel %vm237_vm3, %v206_v7, %v229_v20 }
  0xba   : > { %v236_v19 = vsel %vm235_vm1, %v232_v15, %v234_v17 }
  0xbb   : > { %v243_v22 = vsel %vm241_vm4, %v240_v21, %v236_v19 }
  0xbc   : > { %v254_v23 = vsel %vm253_vm5, %v243_v22, 0 }
  0xbd   : > { %418 = vmatpush3.bf16.msra.mxu0 %v254_v23 }
  0xc0   : > { %420 = vmatmul.mubr.msk.bf16.vlgmr.msra.gmra.mrb[0].mxu0 %vm249_vm6, %v204_v24 }
  0xc8   : > { %v247_v25 = vpop.permute.xlu0 %246 }
 0x193   : > { %v290_v26 = vpop.f32.mrb[0].mxu0 }
 0x194   : > { %v291_v27 = vadd.f32 %v290_v26, %v247_v25  ;;  %v421_v28 = vpop.f32.mrb[1].mxu0 }
 0x195   : > { %v293_v29 = vpop.f32.mrb[2].mxu0 }
 0x196   : > { %v422_v30 = vpop.f32.mrb[3].mxu0  ;;  %vm296_vm7 = vcmp.gt.f32.partialorder %v291_v27, 0.0  ;;  %v297_v31 = vmul.f32 0.1, %v291_v27 }
 0x198   : > { %v298_v32 = vsel %vm296_vm7, %v291_v27, %v297_v31 }
 0x199   : > { %299 = vadd.xlane.f32.xlu1 %v298_v32  ;;  %v301_v33 = vmul.f32 %v298_v32, %v298_v32 }
 0x19b   : > { %302 = vadd.xlane.f32.xlu0 %v301_v33 }
 0x223   : > { %309 = sbr.rel (%p411_p7) target bundleno = 555 (0x22b), region = 40 }
 0x226   : > { %v300_v34 = vpop.xlane.xlu1 %299 }
 0x228   : > { %v303_v35 = vpop.xlane.xlu0 %302 }
 0x229   : > { %v305_v36 = vsel %vm304_vm8, %v300_v34, %v303_v35 }
 0x22a   : > { %311 = vst.msk [vmem:[%s753_s26] sm:$0xff] %vm310_vm9, %v305_v36 }
 0x22b PF: > { %p412_p11 = scmp.eq.s32.totalorder %s582_s15, 0 }
 0x22c   : > { %vm318_vm10 = vcmask (!%p412_p11), 15360  }
 0x22d   : > { %315 = sbr.rel (%p412_p11) target bundleno = 565 (0x235), region = 44 }
 0x231   : > { %v316_v37 = vld [vmem:[%s753_s26] sm:$0xff] (!%p412_p11) }
 0x232   : > { %v317_v38 = vadd.f32 (!%p412_p11), %v316_v37, %v305_v36 }
 0x234   : > { %319 = vst.msk [vmem:[%s753_s26] sm:$0xff] %vm318_vm10, %v317_v38 }
 0x235 PF: > { %s16_s19 = sadd.s32 1, %s598_s19   ;;  %s799_s12 = smov %s574_s13 }
 0x236   : > { %p13_p12 = scmp.ge.s32.totalorder %s16_s19, 6   ;;  %s800_s13 = smov %s578_s14 }
 0x237   : > { %s801_s14 = smov %s694_s5  ;;  %s802_s15 = smov %s590_s17 }
 0x238   : > { %s803_s16 = smov %s594_s18  ;;  %s804_s17 = smov %s807_s21 }
 0x239   : > { %s805_s18 = smov %s811_s22  ;;  %15 = sbr.rel (!%p13_p12) target bundleno = 5 (0x5), region = 80 }
 0x240   :  { %339 = vsyncpa [#allocation3], 1 }
 0x241   :  { %341 = vsyncpa [#allocation3 + $0x1], 1 }

</bundles_post_ra>
